<compile_context>
chip_gen: v5e
topology: v5e:2x2
jax: 0.10.0
libtpu: 0.0.40
codegen_flags: <defaults>
</compile_context>

<pallas_src>
import jax
import jax.numpy as jnp
from jax.experimental import pallas as pl
from jax.experimental.pallas import tpu as pltpu

LANE = 128      # TPU lane width (last dim)
SUBLANE = 8     # TPU sublane width (second-to-last dim, f32)

_VMEM_TILE_BUDGET = 40 * 1024 * 1024   # conservative across v5e/v6e/v7x
_VMEM_LIMIT_CAP = 48 * 1024 * 1024     # <= v7x 64 MiB physical per TC


def _round_up(n, m):
    return ((n + m - 1) // m) * m


def _cdiv(a, b):
    return (a + b - 1) // b


def _pad2d(a, rows, cols):
    r, c = a.shape
    if r == rows and c == cols:
        return a
    return jnp.pad(a, ((0, rows - r), (0, cols - c)))


# ---------------------------------------------------------------------------
# Fused Pallas kernel: both encoders + both decoders in one body.
# Each MLP is  (x @ W1 + b1) -> ReLU -> (h @ W2 + b2).
# ---------------------------------------------------------------------------
def _dccae_fused_kernel(
        x1_ref, x2_ref,
        e1w1_ref, e1b1_ref, e1w2_ref, e1b2_ref,
        e2w1_ref, e2b1_ref, e2w2_ref, e2b2_ref,
        d1w1_ref, d1b1_ref, d1w2_ref, d1b2_ref,
        d2w1_ref, d2b1_ref, d2w2_ref, d2b2_ref,
        z1_ref, z2_ref, r1_ref, r2_ref):

    def mlp(x, w1_ref, b1_ref, w2_ref, b2_ref):
        h = jnp.dot(x, w1_ref[...], preferred_element_type=jnp.float32)
        h = jnp.maximum(h + b1_ref[...], 0.0)
        o = jnp.dot(h, w2_ref[...], preferred_element_type=jnp.float32)
        return o + b2_ref[...]

    # View 1: encode, keep z resident, decode.
    z1 = mlp(x1_ref[...], e1w1_ref, e1b1_ref, e1w2_ref, e1b2_ref)
    z1_ref[...] = z1.astype(z1_ref.dtype)
    r1_ref[...] = mlp(z1, d1w1_ref, d1b1_ref, d1w2_ref, d1b2_ref).astype(r1_ref.dtype)

    # View 2: encode, keep z resident, decode.
    z2 = mlp(x2_ref[...], e2w1_ref, e2b1_ref, e2w2_ref, e2b2_ref)
    z2_ref[...] = z2.astype(z2_ref.dtype)
    r2_ref[...] = mlp(z2, d2w1_ref, d2b1_ref, d2w2_ref, d2b2_ref).astype(r2_ref.dtype)


_WEIGHT_ORDER = ("e1w1", "e1b1", "e1w2", "e1b2",
                 "e2w1", "e2b1", "e2w2", "e2b2",
                 "d1w1", "d1b1", "d1w2", "d1b2",
                 "d2w1", "d2b1", "d2w2", "d2b2")


def _choose_tile_m(batch, stream_bytes_per_row, work_bytes_per_row, weight_bytes):
    """Largest batch tile (128..1024 rows) that (a) fits the conservative VMEM
    budget with double-buffered streamed tiles + resident weights, and (b)
    leaves >= 2 grid steps whenever the batch allows it (v7x megacore)."""
    if batch <= LANE:
        return _round_up(max(batch, 1), SUBLANE)
    best = LANE
    for tm in (LANE, 2 * LANE, 4 * LANE, 8 * LANE):   # 128, 256, 512, 1024
        if tm > batch:
            break
        if _cdiv(batch, tm) < 2 and batch >= 2 * LANE:
            break   # keep both v7x TensorCores busy
        need = (weight_bytes
                + 2 * tm * stream_bytes_per_row      # double-buffered streamed tiles
                + tm * work_bytes_per_row)           # in-kernel working set
        if need > _VMEM_TILE_BUDGET:
            break
        best = tm
    return best


def dccae_forward_pallas(x_1, x_2, kparams, latent_dims):
    """Fused DCCAE forward.  kparams holds the 16 lane-padded weight/bias
    tensors (keys in _WEIGHT_ORDER).  Returns (z_1, z_2, x_1_recon, x_2_recon)
    at the logical (unpadded) shapes."""
    batch, d1 = x_1.shape
    batch2, d2 = x_2.shape
    assert batch2 == batch, "both views must share the batch dimension"
    d1p, h1p = kparams["e1w1"].shape
    d2p, h2p = kparams["e2w1"].shape
    lp = kparams["e1w2"].shape[1]
    dtype = x_1.dtype
    itemsize = dtype.itemsize

    # Feature-pad ONLY when the feature dim is not already 128-lane aligned.
    # The batch dim is never padded: the grid handles the remainder block, so
    # aligned inputs (the realistic large-model case) avoid the extra HBM
    # read+write of a wrapper-side jnp.pad entirely.
    x1k = x_1 if d1 == d1p else _pad2d(x_1, batch, d1p)
    x2k = x_2 if d2 == d2p else _pad2d(x_2, batch, d2p)

    w_args = [kparams[name] for name in _WEIGHT_ORDER]
    weight_bytes = sum(int(w.size) * int(w.dtype.itemsize) for w in w_args)

    stream_bytes_per_row = 2 * (d1p + d2p + lp) * itemsize          # x1,x2 in; z1,z2,r1,r2 out
    work_bytes_per_row = (h1p + h2p + 2 * lp + d1p + d2p) * 4       # f32 intermediates

    tile_m = _choose_tile_m(batch, stream_bytes_per_row, work_bytes_per_row,
                            weight_bytes)
    grid = (_cdiv(batch, tile_m),)

    # Explicit scoped-VMEM budget (v5e default is only 16 MiB; v7x physical
    # VMEM is 64 MiB per TC).  Account 2x weights in case Buffered(1) is not
    # honoured by the installed jax version.
    needed = (2 * weight_bytes
              + 2 * tile_m * stream_bytes_per_row
              + tile_m * work_bytes_per_row)
    vmem_limit = int(min(_VMEM_LIMIT_CAP, max(needed + (8 << 20), 32 << 20)))

    def row_map(i):
        return (i, 0)

    def const_map(i):
        return (0, 0)

    def _resident_spec(shape):
        # Constant index map -> fetched once and kept VMEM-resident.
        # Buffered(1) single-buffers it (no second copy of every weight).
        try:
            return pl.BlockSpec(shape, const_map, pipeline_mode=pl.Buffered(1))
        except (TypeError, AttributeError):
            return pl.BlockSpec(shape, const_map)

    in_specs = [pl.BlockSpec((tile_m, d1p), row_map),
                pl.BlockSpec((tile_m, d2p), row_map)]
    in_specs += [_resident_spec(w.shape) for w in w_args]

    out_specs = (pl.BlockSpec((tile_m, lp), row_map),
                 pl.BlockSpec((tile_m, lp), row_map),
                 pl.BlockSpec((tile_m, d1p), row_map),
                 pl.BlockSpec((tile_m, d2p), row_map))
    out_shape = (jax.ShapeDtypeStruct((batch, lp), dtype),
                 jax.ShapeDtypeStruct((batch, lp), dtype),
                 jax.ShapeDtypeStruct((batch, d1p), dtype),
                 jax.ShapeDtypeStruct((batch, d2p), dtype))

    rows = grid[0] * tile_m
    flops = 2 * rows * (d1p * h1p + h1p * lp + lp * h1p + h1p * d1p
                        + d2p * h2p + h2p * lp + lp * h2p + h2p * d2p)
    bytes_accessed = (itemsize * (int(x1k.size) + int(x2k.size)
                                  + batch * (2 * lp + d1p + d2p))
                      + weight_bytes)

    z1p, z2p, r1p, r2p = pl.pallas_call(
        _dccae_fused_kernel,
        out_shape=out_shape,
        grid=grid,
        in_specs=in_specs,
        out_specs=out_specs,
        compiler_params=pltpu.CompilerParams(
            dimension_semantics=("parallel",),
            vmem_limit_bytes=vmem_limit),
        cost_estimate=pl.CostEstimate(
            flops=int(flops), transcendentals=0,
            bytes_accessed=int(bytes_accessed)),
    )(x1k, x2k, *w_args)

    z_1 = z1p if latent_dims == lp else z1p[:, :latent_dims]
    z_2 = z2p if latent_dims == lp else z2p[:, :latent_dims]
    r_1 = r1p if d1 == d1p else r1p[:, :d1]
    r_2 = r2p if d2 == d2p else r2p[:, :d2]
    return z_1, z_2, r_1, r_2


# ---------------------------------------------------------------------------
# Deterministic parameter construction (PyTorch nn.Linear-style uniform init)
# ---------------------------------------------------------------------------
def _linear_params(key, fan_in, fan_out, dtype=jnp.float32):
    kw, kb = jax.random.split(key)
    bound = 1.0 / jnp.sqrt(float(fan_in))
    w = jax.random.uniform(kw, (fan_in, fan_out), dtype, -bound, bound)
    b = jax.random.uniform(kb, (1, fan_out), dtype, -bound, bound)
    return w, b


def _mlp_params(key, in_dim, hidden, out_dim, dtype=jnp.float32):
    k1, k2 = jax.random.split(key)
    w1, b1 = _linear_params(k1, in_dim, hidden, dtype)
    w2, b2 = _linear_params(k2, hidden, out_dim, dtype)
    return dict(w1=w1, b1=b1, w2=w2, b2=b2)


def _pad_mlp(p, in_p, hid_p, out_p):
    return dict(w1=_pad2d(p["w1"], in_p, hid_p),
                b1=_pad2d(p["b1"], 1, hid_p),
                w2=_pad2d(p["w2"], hid_p, out_p),
                b2=_pad2d(p["b2"], 1, out_p))


# ---------------------------------------------------------------------------
# DCCAE forward (fcn / fcn)
# ---------------------------------------------------------------------------
class DCCAEPallas:
    def __init__(self, input_size_1, input_size_2, hidden_1=128, hidden_2=128,
                 latent_dims=2, key=jax.random.PRNGKey(0)):
        ke1, kd1, ke2, kd2 = jax.random.split(key, 4)
        self.latent_dims = latent_dims

        # Logical (unpadded) parameters — also used by the pure-JAX reference.
        self.enc1 = _mlp_params(ke1, input_size_1, hidden_1, latent_dims)
        self.enc2 = _mlp_params(ke2, input_size_2, hidden_2, latent_dims)
        self.dec1 = _mlp_params(kd1, latent_dims, hidden_1, input_size_1)
        self.dec2 = _mlp_params(kd2, latent_dims, hidden_2, input_size_2)

        # Lane-padded parameters (padded once, up front).  Only rounded to the
        # next multiple of 128 — the kernel is HBM-bound, so no extra "MXU
        # fill" padding beyond that.
        d1p = _round_up(input_size_1, LANE)
        d2p = _round_up(input_size_2, LANE)
        h1p = _round_up(hidden_1, LANE)
        h2p = _round_up(hidden_2, LANE)
        lp = _round_up(latent_dims, LANE)

        e1 = _pad_mlp(self.enc1, d1p, h1p, lp)
        e2 = _pad_mlp(self.enc2, d2p, h2p, lp)
        dc1 = _pad_mlp(self.dec1, lp, h1p, d1p)
        dc2 = _pad_mlp(self.dec2, lp, h2p, d2p)

        self.kparams = {
            "e1w1": e1["w1"], "e1b1": e1["b1"], "e1w2": e1["w2"], "e1b2": e1["b2"],
            "e2w1": e2["w1"], "e2b1": e2["b1"], "e2w2": e2["w2"], "e2b2": e2["b2"],
            "d1w1": dc1["w1"], "d1b1": dc1["b1"], "d1w2": dc1["w2"], "d1b2": dc1["b2"],
            "d2w1": dc2["w1"], "d2b1": dc2["b1"], "d2w2": dc2["w2"], "d2b2": dc2["b2"],
        }

    def forward(self, x_1, x_2):
        return dccae_forward_pallas(x_1, x_2, self.kparams, self.latent_dims)

    # encode reuses the same fused kernel (forward is the hot path).
    def encode(self, x_1, x_2):
        z_1, z_2, _, _ = self.forward(x_1, x_2)
        return z_1, z_2


# ---------------------------------------------------------------------------
# Reference (pure JAX) to sanity-check the kernel
# ---------------------------------------------------------------------------
def _mlp2_ref(x, p):
    h = jnp.maximum(x @ p["w1"] + p["b1"], 0.0)
    return h @ p["w2"] + p["b2"]


if __name__ == "__main__":
    key = jax.random.PRNGKey(0)
    k_x1, k_x2, k_params, k_y1, k_y2, k_params2 = jax.random.split(key, 6)

    # --- Test 1: small shapes, unaligned feature dims (exercises lane padding)
    batch = 8
    input_size_1 = 16
    input_size_2 = 20
    latent_dims = 2
    hidden = 32

    x_1 = jax.random.normal(k_x1, (batch, input_size_1), jnp.float32)
    x_2 = jax.random.normal(k_x2, (batch, input_size_2), jnp.float32)

    model = DCCAEPallas(input_size_1, input_size_2, hidden_1=hidden,
                        hidden_2=hidden, latent_dims=latent_dims, key=k_params)

    z_1, z_2, x_1_recon, x_2_recon = model.forward(x_1, x_2)
    jax.block_until_ready((z_1, z_2, x_1_recon, x_2_recon))

    assert z_1.shape == (batch, latent_dims)
    assert z_2.shape == (batch, latent_dims)
    assert x_1_recon.shape == (batch, input_size_1)
    assert x_2_recon.shape == (batch, input_size_2)

    z_1_ref = _mlp2_ref(x_1, model.enc1)
    z_2_ref = _mlp2_ref(x_2, model.enc2)
    x_1_rec_ref = _mlp2_ref(z_1_ref, model.dec1)
    x_2_rec_ref = _mlp2_ref(z_2_ref, model.dec2)
    assert jnp.allclose(z_1, z_1_ref, atol=1e-4)
    assert jnp.allclose(z_2, z_2_ref, atol=1e-4)
    assert jnp.allclose(x_1_recon, x_1_rec_ref, atol=1e-4)
    assert jnp.allclose(x_2_recon, x_2_rec_ref, atol=1e-4)

    # --- Test 2: lane-aligned features (no wrapper padding at all), multi-step
    #     grid with a partial last batch block (300 rows, tile 256).
    batch_b, d1b, d2b, lat_b = 300, 256, 384, 8
    model_b = DCCAEPallas(d1b, d2b, hidden_1=128, hidden_2=128,
                          latent_dims=lat_b, key=k_params2)
    y_1 = jax.random.normal(k_y1, (batch_b, d1b), jnp.float32)
    y_2 = jax.random.normal(k_y2, (batch_b, d2b), jnp.float32)
    zb1, zb2, rb1, rb2 = model_b.forward(y_1, y_2)
    jax.block_until_ready((zb1, zb2, rb1, rb2))

    assert zb1.shape == (batch_b, lat_b) and zb2.shape == (batch_b, lat_b)
    assert rb1.shape == (batch_b, d1b) and rb2.shape == (batch_b, d2b)

    zb1_ref = _mlp2_ref(y_1, model_b.enc1)
    zb2_ref = _mlp2_ref(y_2, model_b.enc2)
    rb1_ref = _mlp2_ref(zb1_ref, model_b.dec1)
    rb2_ref = _mlp2_ref(zb2_ref, model_b.dec2)
    # Looser tolerance: the XLA reference matmul may use a different f32
    # precision path than the in-kernel MXU dot at K>=256.
    assert jnp.allclose(zb1, zb1_ref, atol=5e-2, rtol=5e-2)
    assert jnp.allclose(zb2, zb2_ref, atol=5e-2, rtol=5e-2)
    assert jnp.allclose(rb1, rb1_ref, atol=5e-2, rtol=5e-2)
    assert jnp.allclose(rb2, rb2_ref, atol=5e-2, rtol=5e-2)

    print("KERNEL_OK")
</pallas_src>

<mosaic_0001>
module attributes {stable_mosaic.version = 11 : i64} {
  func.func @_dccae_fused_kernel(%arg0: i32, %arg1: memref<8x128xf32, #tpu.memory_space<vmem>>, %arg2: memref<8x128xf32, #tpu.memory_space<vmem>>, %arg3: memref<128x128xf32, #tpu.memory_space<vmem>>, %arg4: memref<1x128xf32, #tpu.memory_space<vmem>>, %arg5: memref<128x128xf32, #tpu.memory_space<vmem>>, %arg6: memref<1x128xf32, #tpu.memory_space<vmem>>, %arg7: memref<128x128xf32, #tpu.memory_space<vmem>>, %arg8: memref<1x128xf32, #tpu.memory_space<vmem>>, %arg9: memref<128x128xf32, #tpu.memory_space<vmem>>, %arg10: memref<1x128xf32, #tpu.memory_space<vmem>>, %arg11: memref<128x128xf32, #tpu.memory_space<vmem>>, %arg12: memref<1x128xf32, #tpu.memory_space<vmem>>, %arg13: memref<128x128xf32, #tpu.memory_space<vmem>>, %arg14: memref<1x128xf32, #tpu.memory_space<vmem>>, %arg15: memref<128x128xf32, #tpu.memory_space<vmem>>, %arg16: memref<1x128xf32, #tpu.memory_space<vmem>>, %arg17: memref<128x128xf32, #tpu.memory_space<vmem>>, %arg18: memref<1x128xf32, #tpu.memory_space<vmem>>, %arg19: memref<8x128xf32, #tpu.memory_space<vmem>>, %arg20: memref<8x128xf32, #tpu.memory_space<vmem>>, %arg21: memref<8x128xf32, #tpu.memory_space<vmem>>, %arg22: memref<8x128xf32, #tpu.memory_space<vmem>>) attributes {dimension_semantics = [#tpu.dimension_semantics<parallel>], iteration_bounds = array<i64: 1>, scalar_prefetch = 0 : i64, scratch_operands = 0 : i64, tpu.core_type = #tpu.core_type<tc>, window_params = [{transform_indices = @transform_0, window_bounds = array<i64: 8, 128>}, {transform_indices = @transform_1, window_bounds = array<i64: 8, 128>}, {pipeline_mode = #tpu.pipeline_mode<synchronous>, transform_indices = @transform_2, window_bounds = array<i64: 128, 128>}, {pipeline_mode = #tpu.pipeline_mode<synchronous>, transform_indices = @transform_3, window_bounds = array<i64: 1, 128>}, {pipeline_mode = #tpu.pipeline_mode<synchronous>, transform_indices = @transform_4, window_bounds = array<i64: 128, 128>}, {pipeline_mode = #tpu.pipeline_mode<synchronous>, transform_indices = @transform_5, window_bounds = array<i64: 1, 128>}, {pipeline_mode = #tpu.pipeline_mode<synchronous>, transform_indices = @transform_6, window_bounds = array<i64: 128, 128>}, {pipeline_mode = #tpu.pipeline_mode<synchronous>, transform_indices = @transform_7, window_bounds = array<i64: 1, 128>}, {pipeline_mode = #tpu.pipeline_mode<synchronous>, transform_indices = @transform_8, window_bounds = array<i64: 128, 128>}, {pipeline_mode = #tpu.pipeline_mode<synchronous>, transform_indices = @transform_9, window_bounds = array<i64: 1, 128>}, {pipeline_mode = #tpu.pipeline_mode<synchronous>, transform_indices = @transform_10, window_bounds = array<i64: 128, 128>}, {pipeline_mode = #tpu.pipeline_mode<synchronous>, transform_indices = @transform_11, window_bounds = array<i64: 1, 128>}, {pipeline_mode = #tpu.pipeline_mode<synchronous>, transform_indices = @transform_12, window_bounds = array<i64: 128, 128>}, {pipeline_mode = #tpu.pipeline_mode<synchronous>, transform_indices = @transform_13, window_bounds = array<i64: 1, 128>}, {pipeline_mode = #tpu.pipeline_mode<synchronous>, transform_indices = @transform_14, window_bounds = array<i64: 128, 128>}, {pipeline_mode = #tpu.pipeline_mode<synchronous>, transform_indices = @transform_15, window_bounds = array<i64: 1, 128>}, {pipeline_mode = #tpu.pipeline_mode<synchronous>, transform_indices = @transform_16, window_bounds = array<i64: 128, 128>}, {pipeline_mode = #tpu.pipeline_mode<synchronous>, transform_indices = @transform_17, window_bounds = array<i64: 1, 128>}, {transform_indices = @transform_18, window_bounds = array<i64: 8, 128>}, {transform_indices = @transform_19, window_bounds = array<i64: 8, 128>}, {transform_indices = @transform_20, window_bounds = array<i64: 8, 128>}, {transform_indices = @transform_21, window_bounds = array<i64: 8, 128>}]} {
    %c0 = arith.constant 0 : index
    %c0_0 = arith.constant 0 : index
    %0 = vector.load %arg1[%c0, %c0_0] : memref<8x128xf32, #tpu.memory_space<vmem>>, vector<8x128xf32>
    %c0_1 = arith.constant 0 : index
    %c0_2 = arith.constant 0 : index
    %1 = vector.load %arg3[%c0_1, %c0_2] : memref<128x128xf32, #tpu.memory_space<vmem>>, vector<128x128xf32>
    %cst = arith.constant dense<0.000000e+00> : vector<8x128xf32>
    %2 = tpu.matmul %0, %1, %cst {dimension_numbers = #tpu.dot_dimension_numbers<[1], [0], [0], [1], [0, 0, 1, 1], [], []>} : vector<8x128xf32>, vector<128x128xf32>, vector<8x128xf32> -> vector<8x128xf32>
    %c0_3 = arith.constant 0 : index
    %c0_4 = arith.constant 0 : index
    %3 = vector.load %arg4[%c0_3, %c0_4] : memref<1x128xf32, #tpu.memory_space<vmem>>, vector<1x128xf32>
    %4 = vector.broadcast %3 : vector<1x128xf32> to vector<8x128xf32>
    %5 = arith.addf %2, %4 : vector<8x128xf32>
    %cst_5 = arith.constant 0.000000e+00 : f32
    %6 = vector.broadcast %cst_5 : f32 to vector<8x128xf32>
    %7 = arith.maximumf %5, %6 : vector<8x128xf32>
    %c0_6 = arith.constant 0 : index
    %c0_7 = arith.constant 0 : index
    %8 = vector.load %arg5[%c0_6, %c0_7] : memref<128x128xf32, #tpu.memory_space<vmem>>, vector<128x128xf32>
    %cst_8 = arith.constant dense<0.000000e+00> : vector<8x128xf32>
    %9 = tpu.matmul %7, %8, %cst_8 {dimension_numbers = #tpu.dot_dimension_numbers<[1], [0], [0], [1], [0, 0, 1, 1], [], []>} : vector<8x128xf32>, vector<128x128xf32>, vector<8x128xf32> -> vector<8x128xf32>
    %c0_9 = arith.constant 0 : index
    %c0_10 = arith.constant 0 : index
    %10 = vector.load %arg6[%c0_9, %c0_10] : memref<1x128xf32, #tpu.memory_space<vmem>>, vector<1x128xf32>
    %11 = vector.broadcast %10 : vector<1x128xf32> to vector<8x128xf32>
    %12 = arith.addf %9, %11 : vector<8x128xf32>
    %c0_11 = arith.constant 0 : index
    %c0_12 = arith.constant 0 : index
    %13 = vector.load %arg19[%c0_11, %c0_12] : memref<8x128xf32, #tpu.memory_space<vmem>>, vector<8x128xf32>
    tpu.vector_store %arg19[%c0_11, %c0_12], %12 {strides = array<i32>} : memref<8x128xf32, #tpu.memory_space<vmem>>, vector<8x128xf32>,
    %c0_13 = arith.constant 0 : index
    %c0_14 = arith.constant 0 : index
    %14 = vector.load %arg11[%c0_13, %c0_14] : memref<128x128xf32, #tpu.memory_space<vmem>>, vector<128x128xf32>
    %cst_15 = arith.constant dense<0.000000e+00> : vector<8x128xf32>
    %15 = tpu.matmul %12, %14, %cst_15 {dimension_numbers = #tpu.dot_dimension_numbers<[1], [0], [0], [1], [0, 0, 1, 1], [], []>} : vector<8x128xf32>, vector<128x128xf32>, vector<8x128xf32> -> vector<8x128xf32>
    %c0_16 = arith.constant 0 : index
    %c0_17 = arith.constant 0 : index
    %16 = vector.load %arg12[%c0_16, %c0_17] : memref<1x128xf32, #tpu.memory_space<vmem>>, vector<1x128xf32>
    %17 = vector.broadcast %16 : vector<1x128xf32> to vector<8x128xf32>
    %18 = arith.addf %15, %17 : vector<8x128xf32>
    %cst_18 = arith.constant 0.000000e+00 : f32
    %19 = vector.broadcast %cst_18 : f32 to vector<8x128xf32>
    %20 = arith.maximumf %18, %19 : vector<8x128xf32>
    %c0_19 = arith.constant 0 : index
    %c0_20 = arith.constant 0 : index
    %21 = vector.load %arg13[%c0_19, %c0_20] : memref<128x128xf32, #tpu.memory_space<vmem>>, vector<128x128xf32>
    %cst_21 = arith.constant dense<0.000000e+00> : vector<8x128xf32>
    %22 = tpu.matmul %20, %21, %cst_21 {dimension_numbers = #tpu.dot_dimension_numbers<[1], [0], [0], [1], [0, 0, 1, 1], [], []>} : vector<8x128xf32>, vector<128x128xf32>, vector<8x128xf32> -> vector<8x128xf32>
    %c0_22 = arith.constant 0 : index
    %c0_23 = arith.constant 0 : index
    %23 = vector.load %arg14[%c0_22, %c0_23] : memref<1x128xf32, #tpu.memory_space<vmem>>, vector<1x128xf32>
    %24 = vector.broadcast %23 : vector<1x128xf32> to vector<8x128xf32>
    %25 = arith.addf %22, %24 : vector<8x128xf32>
    %c0_24 = arith.constant 0 : index
    %c0_25 = arith.constant 0 : index
    %26 = vector.load %arg21[%c0_24, %c0_25] : memref<8x128xf32, #tpu.memory_space<vmem>>, vector<8x128xf32>
    tpu.vector_store %arg21[%c0_24, %c0_25], %25 {strides = array<i32>} : memref<8x128xf32, #tpu.memory_space<vmem>>, vector<8x128xf32>,
    %c0_26 = arith.constant 0 : index
    %c0_27 = arith.constant 0 : index
    %27 = vector.load %arg2[%c0_26, %c0_27] : memref<8x128xf32, #tpu.memory_space<vmem>>, vector<8x128xf32>
    %c0_28 = arith.constant 0 : index
    %c0_29 = arith.constant 0 : index
    %28 = vector.load %arg7[%c0_28, %c0_29] : memref<128x128xf32, #tpu.memory_space<vmem>>, vector<128x128xf32>
    %cst_30 = arith.constant dense<0.000000e+00> : vector<8x128xf32>
    %29 = tpu.matmul %27, %28, %cst_30 {dimension_numbers = #tpu.dot_dimension_numbers<[1], [0], [0], [1], [0, 0, 1, 1], [], []>} : vector<8x128xf32>, vector<128x128xf32>, vector<8x128xf32> -> vector<8x128xf32>
    %c0_31 = arith.constant 0 : index
    %c0_32 = arith.constant 0 : index
    %30 = vector.load %arg8[%c0_31, %c0_32] : memref<1x128xf32, #tpu.memory_space<vmem>>, vector<1x128xf32>
    %31 = vector.broadcast %30 : vector<1x128xf32> to vector<8x128xf32>
    %32 = arith.addf %29, %31 : vector<8x128xf32>
    %cst_33 = arith.constant 0.000000e+00 : f32
    %33 = vector.broadcast %cst_33 : f32 to vector<8x128xf32>
    %34 = arith.maximumf %32, %33 : vector<8x128xf32>
    %c0_34 = arith.constant 0 : index
    %c0_35 = arith.constant 0 : index
    %35 = vector.load %arg9[%c0_34, %c0_35] : memref<128x128xf32, #tpu.memory_space<vmem>>, vector<128x128xf32>
    %cst_36 = arith.constant dense<0.000000e+00> : vector<8x128xf32>
    %36 = tpu.matmul %34, %35, %cst_36 {dimension_numbers = #tpu.dot_dimension_numbers<[1], [0], [0], [1], [0, 0, 1, 1], [], []>} : vector<8x128xf32>, vector<128x128xf32>, vector<8x128xf32> -> vector<8x128xf32>
    %c0_37 = arith.constant 0 : index
    %c0_38 = arith.constant 0 : index
    %37 = vector.load %arg10[%c0_37, %c0_38] : memref<1x128xf32, #tpu.memory_space<vmem>>, vector<1x128xf32>
    %38 = vector.broadcast %37 : vector<1x128xf32> to vector<8x128xf32>
    %39 = arith.addf %36, %38 : vector<8x128xf32>
    %c0_39 = arith.constant 0 : index
    %c0_40 = arith.constant 0 : index
    %40 = vector.load %arg20[%c0_39, %c0_40] : memref<8x128xf32, #tpu.memory_space<vmem>>, vector<8x128xf32>
    tpu.vector_store %arg20[%c0_39, %c0_40], %39 {strides = array<i32>} : memref<8x128xf32, #tpu.memory_space<vmem>>, vector<8x128xf32>,
    %c0_41 = arith.constant 0 : index
    %c0_42 = arith.constant 0 : index
    %41 = vector.load %arg15[%c0_41, %c0_42] : memref<128x128xf32, #tpu.memory_space<vmem>>, vector<128x128xf32>
    %cst_43 = arith.constant dense<0.000000e+00> : vector<8x128xf32>
    %42 = tpu.matmul %39, %41, %cst_43 {dimension_numbers = #tpu.dot_dimension_numbers<[1], [0], [0], [1], [0, 0, 1, 1], [], []>} : vector<8x128xf32>, vector<128x128xf32>, vector<8x128xf32> -> vector<8x128xf32>
    %c0_44 = arith.constant 0 : index
    %c0_45 = arith.constant 0 : index
    %43 = vector.load %arg16[%c0_44, %c0_45] : memref<1x128xf32, #tpu.memory_space<vmem>>, vector<1x128xf32>
    %44 = vector.broadcast %43 : vector<1x128xf32> to vector<8x128xf32>
    %45 = arith.addf %42, %44 : vector<8x128xf32>
    %cst_46 = arith.constant 0.000000e+00 : f32
    %46 = vector.broadcast %cst_46 : f32 to vector<8x128xf32>
    %47 = arith.maximumf %45, %46 : vector<8x128xf32>
    %c0_47 = arith.constant 0 : index
    %c0_48 = arith.constant 0 : index
    %48 = vector.load %arg17[%c0_47, %c0_48] : memref<128x128xf32, #tpu.memory_space<vmem>>, vector<128x128xf32>
    %cst_49 = arith.constant dense<0.000000e+00> : vector<8x128xf32>
    %49 = tpu.matmul %47, %48, %cst_49 {dimension_numbers = #tpu.dot_dimension_numbers<[1], [0], [0], [1], [0, 0, 1, 1], [], []>} : vector<8x128xf32>, vector<128x128xf32>, vector<8x128xf32> -> vector<8x128xf32>
    %c0_50 = arith.constant 0 : index
    %c0_51 = arith.constant 0 : index
    %50 = vector.load %arg18[%c0_50, %c0_51] : memref<1x128xf32, #tpu.memory_space<vmem>>, vector<1x128xf32>
    %51 = vector.broadcast %50 : vector<1x128xf32> to vector<8x128xf32>
    %52 = arith.addf %49, %51 : vector<8x128xf32>
    %c0_52 = arith.constant 0 : index
    %c0_53 = arith.constant 0 : index
    %53 = vector.load %arg22[%c0_52, %c0_53] : memref<8x128xf32, #tpu.memory_space<vmem>>, vector<8x128xf32>
    tpu.vector_store %arg22[%c0_52, %c0_53], %52 {strides = array<i32>} : memref<8x128xf32, #tpu.memory_space<vmem>>, vector<8x128xf32>,
    return
  }
  func.func @transform_0(%arg0: i32) -> (i32, i32) {
    %c0_i32 = arith.constant 0 : i32
    %c0_i32_0 = arith.constant 0 : i32
    return %arg0, %c0_i32 : i32, i32
  }
  func.func @transform_1(%arg0: i32) -> (i32, i32) {
    %c0_i32 = arith.constant 0 : i32
    %c0_i32_0 = arith.constant 0 : i32
    return %arg0, %c0_i32 : i32, i32
  }
  func.func @transform_2(%arg0: i32) -> (i32, i32) {
    %c0_i32 = arith.constant 0 : i32
    %c0_i32_0 = arith.constant 0 : i32
    %c0_i32_1 = arith.constant 0 : i32
    return %c0_i32, %c0_i32_0 : i32, i32
  }
  func.func @transform_3(%arg0: i32) -> (i32, i32) {
    %c0_i32 = arith.constant 0 : i32
    %c0_i32_0 = arith.constant 0 : i32
    %c0_i32_1 = arith.constant 0 : i32
    return %c0_i32, %c0_i32_0 : i32, i32
  }
  func.func @transform_4(%arg0: i32) -> (i32, i32) {
    %c0_i32 = arith.constant 0 : i32
    %c0_i32_0 = arith.constant 0 : i32
    %c0_i32_1 = arith.constant 0 : i32
    return %c0_i32, %c0_i32_0 : i32, i32
  }
  func.func @transform_5(%arg0: i32) -> (i32, i32) {
    %c0_i32 = arith.constant 0 : i32
    %c0_i32_0 = arith.constant 0 : i32
    %c0_i32_1 = arith.constant 0 : i32
    return %c0_i32, %c0_i32_0 : i32, i32
  }
  func.func @transform_6(%arg0: i32) -> (i32, i32) {
    %c0_i32 = arith.constant 0 : i32
    %c0_i32_0 = arith.constant 0 : i32
    %c0_i32_1 = arith.constant 0 : i32
    return %c0_i32, %c0_i32_0 : i32, i32
  }
  func.func @transform_7(%arg0: i32) -> (i32, i32) {
    %c0_i32 = arith.constant 0 : i32
    %c0_i32_0 = arith.constant 0 : i32
    %c0_i32_1 = arith.constant 0 : i32
    return %c0_i32, %c0_i32_0 : i32, i32
  }
  func.func @transform_8(%arg0: i32) -> (i32, i32) {
    %c0_i32 = arith.constant 0 : i32
    %c0_i32_0 = arith.constant 0 : i32
    %c0_i32_1 = arith.constant 0 : i32
    return %c0_i32, %c0_i32_0 : i32, i32
  }
  func.func @transform_9(%arg0: i32) -> (i32, i32) {
    %c0_i32 = arith.constant 0 : i32
    %c0_i32_0 = arith.constant 0 : i32
    %c0_i32_1 = arith.constant 0 : i32
    return %c0_i32, %c0_i32_0 : i32, i32
  }
  func.func @transform_10(%arg0: i32) -> (i32, i32) {
    %c0_i32 = arith.constant 0 : i32
    %c0_i32_0 = arith.constant 0 : i32
    %c0_i32_1 = arith.constant 0 : i32
    return %c0_i32, %c0_i32_0 : i32, i32
  }
  func.func @transform_11(%arg0: i32) -> (i32, i32) {
    %c0_i32 = arith.constant 0 : i32
    %c0_i32_0 = arith.constant 0 : i32
    %c0_i32_1 = arith.constant 0 : i32
    return %c0_i32, %c0_i32_0 : i32, i32
  }
  func.func @transform_12(%arg0: i32) -> (i32, i32) {
    %c0_i32 = arith.constant 0 : i32
    %c0_i32_0 = arith.constant 0 : i32
    %c0_i32_1 = arith.constant 0 : i32
    return %c0_i32, %c0_i32_0 : i32, i32
  }
  func.func @transform_13(%arg0: i32) -> (i32, i32) {
    %c0_i32 = arith.constant 0 : i32
    %c0_i32_0 = arith.constant 0 : i32
    %c0_i32_1 = arith.constant 0 : i32
    return %c0_i32, %c0_i32_0 : i32, i32
  }
  func.func @transform_14(%arg0: i32) -> (i32, i32) {
    %c0_i32 = arith.constant 0 : i32
    %c0_i32_0 = arith.constant 0 : i32
    %c0_i32_1 = arith.constant 0 : i32
    return %c0_i32, %c0_i32_0 : i32, i32
  }
  func.func @transform_15(%arg0: i32) -> (i32, i32) {
    %c0_i32 = arith.constant 0 : i32
    %c0_i32_0 = arith.constant 0 : i32
    %c0_i32_1 = arith.constant 0 : i32
    return %c0_i32, %c0_i32_0 : i32, i32
  }
  func.func @transform_16(%arg0: i32) -> (i32, i32) {
    %c0_i32 = arith.constant 0 : i32
    %c0_i32_0 = arith.constant 0 : i32
    %c0_i32_1 = arith.constant 0 : i32
    return %c0_i32, %c0_i32_0 : i32, i32
  }
  func.func @transform_17(%arg0: i32) -> (i32, i32) {
    %c0_i32 = arith.constant 0 : i32
    %c0_i32_0 = arith.constant 0 : i32
    %c0_i32_1 = arith.constant 0 : i32
    return %c0_i32, %c0_i32_0 : i32, i32
  }
  func.func @transform_18(%arg0: i32) -> (i32, i32) {
    %c0_i32 = arith.constant 0 : i32
    %c0_i32_0 = arith.constant 0 : i32
    return %arg0, %c0_i32 : i32, i32
  }
  func.func @transform_19(%arg0: i32) -> (i32, i32) {
    %c0_i32 = arith.constant 0 : i32
    %c0_i32_0 = arith.constant 0 : i32
    return %arg0, %c0_i32 : i32, i32
  }
  func.func @transform_20(%arg0: i32) -> (i32, i32) {
    %c0_i32 = arith.constant 0 : i32
    %c0_i32_0 = arith.constant 0 : i32
    return %arg0, %c0_i32 : i32, i32
  }
  func.func @transform_21(%arg0: i32) -> (i32, i32) {
    %c0_i32 = arith.constant 0 : i32
    %c0_i32_0 = arith.constant 0 : i32
    return %arg0, %c0_i32 : i32, i32
  }
}

</mosaic_0001>

<bundles_post_ra>
// kernel: tpu_custom_call.1
= control target key start
LH: loop header
LB: loop body
LE: loop exit
PB: predicated region body
PF: predicated region fallthrough
CT: control target
= control target key end

     0   :  { %s1211_s0 = inlined_call_operand.hbm [shape: f32[8,128], index: 0, kind: input, shape index: {}]   ;;  %s1212_s1 = inlined_call_operand.hbm [shape: f32[8,128], index: 1, kind: input, shape index: {}]   ;;  %s1213_s2 = inlined_call_operand.hbm [shape: f32[128,128], index: 2, kind: input, shape index: {}]   ;;  %s1214_s3 = inlined_call_operand.vmem [shape: f32[1,128], index: 3, kind: input, shape index: {}]   ;;  %s1215_s4 = inlined_call_operand.hbm [shape: f32[128,128], index: 4, kind: input, shape index: {}]   ;;  %s1216_s5 = inlined_call_operand.vmem [shape: f32[1,128], index: 5, kind: input, shape index: {}]   ;;  %s1217_s6 = inlined_call_operand.hbm [shape: f32[128,128], index: 6, kind: input, shape index: {}]   ;;  %s1218_s7 = inlined_call_operand.vmem [shape: f32[1,128], index: 7, kind: input, shape index: {}]   ;;  %s1219_s8 = inlined_call_operand.hbm [shape: f32[128,128], index: 8, kind: input, shape index: {}]   ;;  %s1220_s9 = inlined_call_operand.vmem [shape: f32[1,128], index: 9, kind: input, shape index: {}]   ;;  %s1221_s10 = inlined_call_operand.hbm [shape: f32[128,128], index: 10, kind: input, shape index: {}]   ;;  %s1222_s11 = inlined_call_operand.vmem [shape: f32[1,128], index: 11, kind: input, shape index: {}]   ;;  %s1223_s12 = inlined_call_operand.hbm [shape: f32[128,128], index: 12, kind: input, shape index: {}]   ;;  %s1224_s13 = inlined_call_operand.vmem [shape: f32[1,128], index: 13, kind: input, shape index: {}]   ;;  %s1225_s14 = inlined_call_operand.hbm [shape: f32[128,128], index: 14, kind: input, shape index: {}]   ;;  %s1226_s15 = inlined_call_operand.vmem [shape: f32[1,128], index: 15, kind: input, shape index: {}]   ;;  %s1227_s16 = inlined_call_operand.hbm [shape: f32[128,128], index: 16, kind: input, shape index: {}]   ;;  %s1228_s17 = inlined_call_operand.vmem [shape: f32[1,128], index: 17, kind: input, shape index: {}]   ;;  %s1229_s18 = inlined_call_operand.hbm [shape: f32[8,128], index: 18, kind: output, shape index: {0}]   ;;  %s1230_s19 = inlined_call_operand.hbm [shape: f32[8,128], index: 19, kind: output, shape index: {1}]   ;;  %s1231_s20 = inlined_call_operand.hbm [shape: f32[8,128], index: 20, kind: output, shape index: {2}]   ;;  %s1232_s21 = inlined_call_operand.hbm [shape: f32[8,128], index: 21, kind: output, shape index: {3}]  }
   0x1   :  { %1233 = sst [smem:[#allocation34_spill]] %s1211_s0 }
   0x2   :  { %1234 = sst [smem:[#allocation35_spill]] %s1212_s1 }
   0x3   :  { %1235 = sst [smem:[#allocation36_spill]] %s1213_s2 }
   0x4   :  { %1236 = sst [smem:[#allocation37_spill]] %s1214_s3 }
   0x5   :  { %1237 = sst [smem:[#allocation38_spill]] %s1215_s4 }
   0x6   :  { %1238 = sst [smem:[#allocation39_spill]] %s1216_s5 }
   0x7   :  { %27 = vsyncpa [#allocation3], 0 }
   0x8   :  { %28 = vsyncpa [#allocation6], 0 }
   0x9   :  { %29 = vsyncpa [#allocation9], 0 }
   0xa   :  { %30 = vsyncpa [#allocation12], 0 }
   0xb   :  { %31 = vsyncpa [#allocation15], 0 }
   0xc   :  { %32 = vsyncpa [#allocation18], 0 }
   0xd   :  { %33 = vsyncpa [#allocation4], 0 }
   0xe   :  { %34 = vsyncpa [#allocation21], 0  ;;  %s1239_s26 = sld [smem:[#allocation35_spill]] }
  0x14   :  { %s52_s27 = sshll.u32 %s1239_s26, 4  ;;  %s53_s27 = int_to_ptr.hbm [resolvable:$true] %s52_s27 }
  0x15   :  { %35 = vsyncpa [#allocation24], 0  ;;  %s995_s3 = smov [#allocation5]   ;;  %s1240_s4 = sld [smem:[#allocation38_spill]] }
  0x16   :  { %s54_s28 = sshll.u32 %s995_s3, 4  ;;  %s996_s5 = smov [#allocation8]   ;;  %s55_s28 = int_to_ptr.vmem [resolvable:$true] %s54_s28 }
  0x17   :  { %57 = dma.hbm_to_vmem [thread:$0]  %s53_s27, 128, %s55_s28, [#allocation6]  }
  0x18   :  { %s79_s22 = sshll.u32 %s996_s5, 4  ;;  %s107_s24 = sshll.u32 %s1219_s8, 4  ;;  %s80_s22 = int_to_ptr.vmem [resolvable:$true] %s79_s22  ;;  %s108_s24 = int_to_ptr.hbm [resolvable:$true] %s107_s24 }
  0x19   :  { %s997_s2 = smov 128   ;;  %s998_s25 = smov 8  }
  0x1a   :  { %s137_s3 = sshll.u32 %s1223_s12, 4  ;;  %s999_s28 = smov [#allocation11]   ;;  %s138_s3 = int_to_ptr.hbm [resolvable:$true] %s137_s3 }
  0x1b   :  { %s77_s30 = sshll.u32 %s1240_s4, 4  ;;  %s109_s29 = sshll.u32 %s999_s28, 4  ;;  %s78_s30 = int_to_ptr.hbm [resolvable:$true] %s77_s30  ;;  %s110_s29 = int_to_ptr.vmem [resolvable:$true] %s109_s29 }
  0x1c   :  { %85 = dma.hbm_to_vmem [thread:$0]  %s78_s30, 2048, %s80_s22, [#allocation9], %s997_s2, %s997_s2, %s998_s25  }
  0x1d   :  { %115 = dma.hbm_to_vmem [thread:$0]  %s108_s24, 2048, %s110_s29, [#allocation12], %s997_s2, %s997_s2, %s998_s25  }
  0x1e   :  { %s1000_s8 = smov [#allocation14]   ;;  %s1241_s23 = sld [smem:[#allocation34_spill]] }
  0x1f   :  { %s139_s0 = sshll.u32 %s1000_s8, 4  ;;  %s1242_s22 = sld [smem:[#allocation36_spill]]  ;;  %s140_s0 = int_to_ptr.vmem [resolvable:$true] %s139_s0 }
  0x20   :  { %145 = dma.hbm_to_vmem [thread:$0]  %s138_s3, 2048, %s140_s0, [#allocation15], %s997_s2, %s997_s2, %s998_s25  }
  0x21   :  { %s1001_s27 = smov [#allocation2]   ;;  %s1002_s24 = smov [#allocation7]  }
  0x22   :  { %s43_s28 = sshll.u32 %s1001_s27, 4  ;;  %s64_s29 = sshll.u32 %s1002_s24, 4  ;;  %s44_s28 = int_to_ptr.vmem [resolvable:$true] %s43_s28  ;;  %s65_s29 = int_to_ptr.vmem [resolvable:$true] %s64_s29 }
  0x23   :  { %s92_s5 = sshll.u32 %s1217_s6, 4  ;;  %s1003_s12 = smov [#allocation10]   ;;  %s93_s5 = int_to_ptr.hbm [resolvable:$true] %s92_s5 }
  0x24   :  { %s41_s1 = sshll.u32 %s1241_s23, 4  ;;  %s122_s23 = sshll.u32 %s1221_s10, 4  ;;  %s42_s1 = int_to_ptr.hbm [resolvable:$true] %s41_s1  ;;  %s123_s23 = int_to_ptr.hbm [resolvable:$true] %s122_s23 }
  0x25   :  { %s62_s26 = sshll.u32 %s1242_s22, 4  ;;  %s94_s30 = sshll.u32 %s1003_s12, 4  ;;  %s63_s26 = int_to_ptr.hbm [resolvable:$true] %s62_s26  ;;  %s95_s30 = int_to_ptr.vmem [resolvable:$true] %s94_s30 }
  0x26   :  { %46 = dma.hbm_to_vmem [thread:$0]  %s42_s1, 128, %s44_s28, [#allocation3]  }
  0x27   :  { %70 = dma.hbm_to_vmem [thread:$0]  %s63_s26, 2048, %s65_s29, [#allocation6], %s997_s2, %s997_s2, %s998_s25  }
  0x28   :  { %100 = dma.hbm_to_vmem [thread:$0]  %s93_s5, 2048, %s95_s30, [#allocation9], %s997_s2, %s997_s2, %s998_s25  }
  0x29   :  { %s1004_s1 = smov [#allocation13]   ;;  %s152_s28 = sshll.u32 %s1225_s14, 4  ;;  %s153_s28 = int_to_ptr.hbm [resolvable:$true] %s152_s28 }
  0x2a   :  { %s124_s6 = sshll.u32 %s1004_s1, 4  ;;  %s167_s24 = sshll.u32 %s1227_s16, 4  ;;  %s125_s6 = int_to_ptr.vmem [resolvable:$true] %s124_s6  ;;  %s168_s24 = int_to_ptr.hbm [resolvable:$true] %s167_s24 }
  0x2b   :  { %130 = dma.hbm_to_vmem [thread:$0]  %s123_s23, 2048, %s125_s6, [#allocation12], %s997_s2, %s997_s2, %s998_s25  }
  0x2c   :  { %s1005_s29 = smov [#allocation16]   ;;  %s1006_s4 = smov [#allocation17]  }
  0x2d   :  { %s154_s8 = sshll.u32 %s1005_s29, 4  ;;  %s169_s14 = sshll.u32 %s1006_s4, 4  ;;  %s155_s8 = int_to_ptr.vmem [resolvable:$true] %s154_s8  ;;  %s170_s14 = int_to_ptr.vmem [resolvable:$true] %s169_s14 }
  0x2e   :  { %160 = dma.hbm_to_vmem [thread:$0]  %s153_s28, 2048, %s155_s8, [#allocation15], %s997_s2, %s997_s2, %s998_s25  }
  0x2f   :  { %175 = dma.hbm_to_vmem [thread:$0]  %s168_s24, 2048, %s170_s14, [#allocation18], %s997_s2, %s997_s2, %s998_s25  }
  0x30   :  { %977 = dma.done.wait [#allocation3], 128  }
  0x31   :  { %978 = vsyncadd [#allocation3], 4294967168 }
  0x32   :  { %979 = dma.done.wait [#allocation6], 2176  }
  0x33   :  { %980 = vsyncadd [#allocation6], 4294965120 }
  0x34   :  { %981 = dma.done.wait [#allocation9], 4096  }
  0x35   :  { %982 = vsyncadd [#allocation9], 4294963200 }
  0x36   :  { %983 = dma.done.wait [#allocation12], 4096  }
  0x37   :  { %984 = vsyncadd [#allocation12], 4294963200 }
  0x38   :  { %985 = dma.done.wait [#allocation15], 4096  }
  0x39   :  { %986 = vsyncadd [#allocation15], 4294963200 }
  0x3a   :  { %987 = dma.done.wait [#allocation18], 2048  }
  0x3b   :  { %988 = vsyncadd [#allocation18], 4294965248  ;;  %v234_v0 = vld [vmem:[#allocation7 + $0x78] sm:$0xff]  ;;  %v233_v1 = vld [vmem:[#allocation7 + $0x70] sm:$0xff]  ;;  %s1243_s25 = sld [smem:[#allocation37_spill]]  ;;  %s1007_s27 = smov [#allocation20]  }
  0x3c   :  { %239 = vmatpush.msra.mxu0 %v234_v0  ;;  %v232_v2 = vld [vmem:[#allocation7 + $0x68] sm:$0xff]  ;;  %v231_v3 = vld [vmem:[#allocation7 + $0x60] sm:$0xff]  ;;  %v230_v4 = vld [vmem:[#allocation7 + $0x58] sm:$0xff]  ;;  %s1244_s23 = sld [smem:[#allocation39_spill]]  ;;  %s566_s26 = sshll.u32 %s1230_s19, 4  ;;  %s567_s26 = int_to_ptr.hbm [resolvable:$true] %s566_s26 }
  0x3d   :  { %v229_v5 = vld [vmem:[#allocation7 + $0x50] sm:$0xff]  ;;  %v228_v6 = vld [vmem:[#allocation7 + $0x48] sm:$0xff]  ;;  %v227_v7 = vld [vmem:[#allocation7 + $0x40] sm:$0xff]  ;;  %s555_s8 = sshll.u32 %s1229_s18, 4  ;;  %s1008_s4 = smov [#allocation19]   ;;  %s556_s8 = int_to_ptr.hbm [resolvable:$true] %s555_s8 }
  0x3e   :  { %240 = vmatpush.msra.mxu0 %v233_v1  ;;  %v226_v8 = vld [vmem:[#allocation7 + $0x38] sm:$0xff]  ;;  %v225_v9 = vld [vmem:[#allocation7 + $0x30] sm:$0xff]  ;;  %v224_v10 = vld [vmem:[#allocation7 + $0x28] sm:$0xff]  ;;  %s553_s14 = sshll.u32 %s1008_s4, 4  ;;  %s1009_s2 = smov [#allocation22]   ;;  %s554_s14 = int_to_ptr.vmem [resolvable:$true] %s553_s14 }
  0x3f   :  { %v223_v11 = vld [vmem:[#allocation7 + $0x20] sm:$0xff]  ;;  %v222_v12 = vld [vmem:[#allocation7 + $0x18] sm:$0xff]  ;;  %v221_v13 = vld [vmem:[#allocation7 + $0x10] sm:$0xff]  ;;  %s577_s3 = sshll.u32 %s1231_s20, 4  ;;  %s1010_s0 = smov [#allocation23]   ;;  %s578_s3 = int_to_ptr.hbm [resolvable:$true] %s577_s3 }
  0x40   :  { %241 = vmatpush.msra.mxu0 %v232_v2  ;;  %v220_v14 = vld [vmem:[#allocation7 + $0x8] sm:$0xff]  ;;  %v219_v15 = vld [vmem:[#allocation7] sm:$0xff]  ;;  %v399_v16 = vld [vmem:[#allocation10 + $0x78] sm:$0xff]  ;;  %s588_s30 = sshll.u32 %s1232_s21, 4  ;;  %s589_s30 = int_to_ptr.hbm [resolvable:$true] %s588_s30 }
  0x41   :  { %v218_v17 = vld [vmem:[#allocation2] sm:$0xff]  ;;  %v275_v19 = vld [vmem:[#allocation8 + $0x78] sm:$0xff]  ;;  %v397_v21 = vld [vmem:[#allocation10 + $0x68] sm:$0xff] }
  0x42   :  { %242 = vmatpush.msra.mxu0 %v231_v3  ;;  %v398_v18 = vld [vmem:[#allocation10 + $0x70] sm:$0xff]  ;;  %280 = vmatpush.msra.mxu1 %v275_v19  ;;  %v273_v22 = vld [vmem:[#allocation8 + $0x68] sm:$0xff]  ;;  %v396_v23 = vld [vmem:[#allocation10 + $0x60] sm:$0xff] }
  0x43   :  { %v274_v20 = vld [vmem:[#allocation8 + $0x70] sm:$0xff]  ;;  %v272_v24 = vld [vmem:[#allocation8 + $0x60] sm:$0xff]  ;;  %v395_v25 = vld [vmem:[#allocation10 + $0x58] sm:$0xff] }
  0x44   :  { %243 = vmatpush.msra.mxu0 %v230_v4  ;;  %281 = vmatpush.msra.mxu1 %v274_v20  ;;  %v271_v26 = vld [vmem:[#allocation8 + $0x58] sm:$0xff]  ;;  %v394_v27 = vld [vmem:[#allocation10 + $0x50] sm:$0xff]  ;;  %v393_v29 = vld [vmem:[#allocation10 + $0x48] sm:$0xff] }
  0x45   :  { %v270_v28 = vld [vmem:[#allocation8 + $0x50] sm:$0xff]  ;;  %v269_v30 = vld [vmem:[#allocation8 + $0x48] sm:$0xff]  ;;  %v392_v31 = vld [vmem:[#allocation10 + $0x40] sm:$0xff] }
  0x46   :  { %244 = vmatpush.msra.mxu0 %v229_v5  ;;  %282 = vmatpush.msra.mxu1 %v273_v22  ;;  %v268_v32 = vld [vmem:[#allocation8 + $0x40] sm:$0xff]  ;;  %v391_v33 = vld [vmem:[#allocation10 + $0x38] sm:$0xff]  ;;  %v390_v35 = vld [vmem:[#allocation10 + $0x30] sm:$0xff] }
  0x47   :  { %v267_v34 = vld [vmem:[#allocation8 + $0x38] sm:$0xff]  ;;  %v266_v36 = vld [vmem:[#allocation8 + $0x30] sm:$0xff]  ;;  %v389_v37 = vld [vmem:[#allocation10 + $0x28] sm:$0xff] }
  0x48   :  { %245 = vmatpush.msra.mxu0 %v228_v6  ;;  %283 = vmatpush.msra.mxu1 %v272_v24  ;;  %v265_v38 = vld [vmem:[#allocation8 + $0x28] sm:$0xff]  ;;  %v388_v39 = vld [vmem:[#allocation10 + $0x20] sm:$0xff]  ;;  %v387_v41 = vld [vmem:[#allocation10 + $0x18] sm:$0xff] }
  0x49   :  { %v264_v40 = vld [vmem:[#allocation8 + $0x20] sm:$0xff]  ;;  %v263_v42 = vld [vmem:[#allocation8 + $0x18] sm:$0xff]  ;;  %v386_v43 = vld [vmem:[#allocation10 + $0x10] sm:$0xff] }
  0x4a   :  { %246 = vmatpush.msra.mxu0 %v227_v7  ;;  %284 = vmatpush.msra.mxu1 %v271_v26  ;;  %v262_v44 = vld [vmem:[#allocation8 + $0x10] sm:$0xff]  ;;  %v385_v45 = vld [vmem:[#allocation10 + $0x8] sm:$0xff]  ;;  %v384_v47 = vld [vmem:[#allocation10] sm:$0xff] }
  0x4b   :  { %v261_v46 = vld [vmem:[#allocation8 + $0x8] sm:$0xff]  ;;  %v260_v48 = vld [vmem:[#allocation8] sm:$0xff]  ;;  %v383_v49 = vld [vmem:[#allocation5] sm:$0xff] }
  0x4c   :  { %247 = vmatpush.msra.mxu0 %v226_v8  ;;  %285 = vmatpush.msra.mxu1 %v270_v28  ;;  %v440_v50 = vld [vmem:[#allocation11 + $0x78] sm:$0xff]  ;;  %v439_v51 = vld [vmem:[#allocation11 + $0x70] sm:$0xff]  ;;  %v438_v52 = vld [vmem:[#allocation11 + $0x68] sm:$0xff] }
  0x4d   :  { %v437_v53 = vld [vmem:[#allocation11 + $0x60] sm:$0xff]  ;;  %v436_v54 = vld [vmem:[#allocation11 + $0x58] sm:$0xff]  ;;  %v435_v55 = vld [vmem:[#allocation11 + $0x50] sm:$0xff] }
  0x4e   :  { %248 = vmatpush.msra.mxu0 %v225_v9  ;;  %286 = vmatpush.msra.mxu1 %v269_v30  ;;  %v434_v56 = vld [vmem:[#allocation11 + $0x48] sm:$0xff]  ;;  %v433_v57 = vld [vmem:[#allocation11 + $0x40] sm:$0xff]  ;;  %v432_v58 = vld [vmem:[#allocation11 + $0x38] sm:$0xff] }
  0x4f   :  { %v431_v59 = vld [vmem:[#allocation11 + $0x30] sm:$0xff]  ;;  %v430_v60 = vld [vmem:[#allocation11 + $0x28] sm:$0xff]  ;;  %v429_v61 = vld [vmem:[#allocation11 + $0x20] sm:$0xff] }
  0x50   :  { %249 = vmatpush.msra.mxu0 %v224_v10  ;;  %287 = vmatpush.msra.mxu1 %v268_v32  ;;  %v428_v62 = vld [vmem:[#allocation11 + $0x18] sm:$0xff]  ;;  %v633_v63 = vld [vmem:[%s1243_s25] ss:$0 sm:$0xff]  ;;  %v426_v1 = vld [vmem:[#allocation11 + $0x8] sm:$0xff]  ;;  %s575_s25 = sshll.u32 %s1009_s2, 4  ;;  %s576_s25 = int_to_ptr.vmem [resolvable:$true] %s575_s25 }
  0x51   :  { %v427_v0 = vld [vmem:[#allocation11 + $0x10] sm:$0xff]  ;;  %v425_v4 = vld [vmem:[#allocation11] sm:$0xff]  ;;  %v316_v6 = vld [vmem:[#allocation13 + $0x78] sm:$0xff] }
  0x52   :  { %250 = vmatpush.msra.mxu0 %v223_v11  ;;  %288 = vmatpush.msra.mxu1 %v267_v34  ;;  %v315_v7 = vld [vmem:[#allocation13 + $0x70] sm:$0xff]  ;;  %v314_v8 = vld [vmem:[#allocation13 + $0x68] sm:$0xff]  ;;  %v313_v9 = vld [vmem:[#allocation13 + $0x60] sm:$0xff] }
  0x53   :  { %321 = vmatpush.msra.mxu2 %v316_v6  ;;  %v312_v10 = vld [vmem:[#allocation13 + $0x58] sm:$0xff]  ;;  %v311_v11 = vld [vmem:[#allocation13 + $0x50] sm:$0xff]  ;;  %v301_v24 = vld [vmem:[#allocation13] sm:$0xff] }
  0x54   :  { %251 = vmatpush.msra.mxu0 %v222_v12  ;;  %289 = vmatpush.msra.mxu1 %v266_v36  ;;  %v310_v12 = vld [vmem:[#allocation13 + $0x48] sm:$0xff]  ;;  %v634_v19 = vld [vmem:[%s1218_s7] ss:$0 sm:$0xff]  ;;  %v477_v30 = vld [vmem:[#allocation16 + $0x58] sm:$0xff] }
  0x55   :  { %322 = vmatpush.msra.mxu2 %v315_v7  ;;  %v303_v20 = vld [vmem:[#allocation13 + $0x10] sm:$0xff]  ;;  %v479_v28 = vld [vmem:[#allocation16 + $0x68] sm:$0xff]  ;;  %v473_v34 = vld [vmem:[#allocation16 + $0x38] sm:$0xff] }
  0x56   :  { %252 = vmatpush.msra.mxu0 %v221_v13  ;;  %290 = vmatpush.msra.mxu1 %v265_v38  ;;  %v309_v13 = vld [vmem:[#allocation13 + $0x40] sm:$0xff]  ;;  %v475_v32 = vld [vmem:[#allocation16 + $0x48] sm:$0xff]  ;;  %v469_v38 = vld [vmem:[#allocation16 + $0x18] sm:$0xff] }
  0x57   :  { %323 = vmatpush.msra.mxu2 %v314_v8  ;;  %v471_v36 = vld [vmem:[#allocation16 + $0x28] sm:$0xff]  ;;  %v515_v7 = vld [vmem:[#allocation17 + $0x40] sm:$0xff]  ;;  %v514_v8 = vld [vmem:[#allocation17 + $0x38] sm:$0xff] }
  0x58   :  { %253 = vmatpush.msra.mxu0 %v220_v14  ;;  %291 = vmatpush.msra.mxu1 %v264_v40  ;;  %v308_v14 = vld [vmem:[#allocation13 + $0x38] sm:$0xff]  ;;  %v635_v40 = vld [vmem:[%s1244_s23] ss:$0 sm:$0xff]  ;;  %v516_v6 = vld [vmem:[#allocation17 + $0x48] sm:$0xff]  ;;  %s586_s23 = sshll.u32 %s1010_s0, 4  ;;  %s587_s23 = int_to_ptr.vmem [resolvable:$true] %s586_s23 }
  0x59   :  { %324 = vmatpush.msra.mxu2 %v313_v9  ;;  %v513_v9 = vld [vmem:[#allocation17 + $0x30] sm:$0xff] }
  0x5a   :  { %254 = vmatpush.msra.mxu0 %v219_v15  ;;  %292 = vmatpush.msra.mxu1 %v263_v42  ;;  %v307_v15 = vld [vmem:[#allocation13 + $0x30] sm:$0xff]  ;;  %v466_v42 = vld [vmem:[#allocation16] sm:$0xff] }
  0x5b   :  { %255 = vmatmul.f32.vlgmr.msra.gmra.mxu0 %v218_v17  ;;  %325 = vmatpush.msra.mxu2 %v312_v10  ;;  %v305_v17 = vld [vmem:[#allocation13 + $0x20] sm:$0xff]  ;;  %v512_v10 = vld [vmem:[#allocation17 + $0x28] sm:$0xff] }
  0x5c   :  { %404 = vmatpush.msrb.mxu0 %v399_v16  ;;  %293 = vmatpush.msra.mxu1 %v262_v44  ;;  %v306_v16 = vld [vmem:[#allocation13 + $0x28] sm:$0xff] }
  0x5d   :  { %326 = vmatpush.msra.mxu2 %v311_v11  ;;  %v511_v11 = vld [vmem:[#allocation17 + $0x20] sm:$0xff] }
  0x5e   :  { %405 = vmatpush.msrb.mxu0 %v398_v18  ;;  %294 = vmatpush.msra.mxu1 %v261_v46  ;;  %v304_v18 = vld [vmem:[#allocation13 + $0x18] sm:$0xff]  ;;  %v356_v46 = vld [vmem:[#allocation14 + $0x70] sm:$0xff] }
  0x5f   :  { %327 = vmatpush.msra.mxu2 %v310_v12  ;;  %v510_v12 = vld [vmem:[#allocation17 + $0x18] sm:$0xff] }
  0x60   :  { %406 = vmatpush.msrb.mxu0 %v397_v21  ;;  %295 = vmatpush.msra.mxu1 %v260_v48  ;;  %v302_v21 = vld [vmem:[#allocation13 + $0x8] sm:$0xff]  ;;  %v354_v48 = vld [vmem:[#allocation14 + $0x60] sm:$0xff] }
  0x61   :  { %328 = vmatpush.msra.mxu2 %v309_v13  ;;  %v637_v13 = vld [vmem:[%s1222_s11] ss:$0 sm:$0xff]  ;;  %s564_s11 = sshll.u32 %s1007_s27, 4  ;;  %s565_s11 = int_to_ptr.vmem [resolvable:$true] %s564_s11 }
  0x62   :  { %407 = vmatpush.msrb.mxu0 %v396_v23  ;;  %445 = vmatpush.msrb.mxu1 %v440_v50  ;;  %v352_v50 = vld [vmem:[#allocation14 + $0x50] sm:$0xff] }
  0x63   :  { %329 = vmatpush.msra.mxu2 %v308_v14  ;;  %v509_v14 = vld [vmem:[#allocation17 + $0x10] sm:$0xff] }
  0x64   :  { %408 = vmatpush.msrb.mxu0 %v395_v25  ;;  %446 = vmatpush.msrb.mxu1 %v439_v51  ;;  %v481_v25 = vld [vmem:[#allocation16 + $0x78] sm:$0xff]  ;;  %v351_v51 = vld [vmem:[#allocation14 + $0x48] sm:$0xff] }
  0x65   :  { %330 = vmatpush.msra.mxu2 %v307_v15  ;;  %v508_v15 = vld [vmem:[#allocation17 + $0x8] sm:$0xff] }
  0x66   :  { %409 = vmatpush.msrb.mxu0 %v394_v27  ;;  %447 = vmatpush.msrb.mxu1 %v438_v52  ;;  %v480_v27 = vld [vmem:[#allocation16 + $0x70] sm:$0xff]  ;;  %v350_v52 = vld [vmem:[#allocation14 + $0x40] sm:$0xff] }
  0x67   :  { %331 = vmatpush.msra.mxu2 %v306_v16 }
  0x68   :  { %410 = vmatpush.msrb.mxu0 %v393_v29  ;;  %448 = vmatpush.msrb.mxu1 %v437_v53  ;;  %v478_v29 = vld [vmem:[#allocation16 + $0x60] sm:$0xff]  ;;  %v349_v53 = vld [vmem:[#allocation14 + $0x38] sm:$0xff] }
  0x69   :  { %332 = vmatpush.msra.mxu2 %v305_v17 }
  0x6a   :  { %411 = vmatpush.msrb.mxu0 %v392_v31  ;;  %449 = vmatpush.msrb.mxu1 %v436_v54  ;;  %v476_v31 = vld [vmem:[#allocation16 + $0x50] sm:$0xff] }
  0x6b   :  { %333 = vmatpush.msra.mxu2 %v304_v18  ;;  %v348_v54 = vld [vmem:[#allocation14 + $0x30] sm:$0xff]  ;;  %v507_v18 = vld [vmem:[#allocation17] sm:$0xff] }
  0x6c   :  { %412 = vmatpush.msrb.mxu0 %v391_v33  ;;  %450 = vmatpush.msrb.mxu1 %v435_v55  ;;  %v474_v33 = vld [vmem:[#allocation16 + $0x40] sm:$0xff]  ;;  %v347_v55 = vld [vmem:[#allocation14 + $0x28] sm:$0xff] }
  0x6d   :  { %334 = vmatpush.msra.mxu2 %v303_v20  ;;  %v638_v20 = vld [vmem:[%s1226_s15] ss:$0 sm:$0xff] }
  0x6e   :  { %413 = vmatpush.msrb.mxu0 %v390_v35  ;;  %451 = vmatpush.msrb.mxu1 %v434_v56  ;;  %v472_v35 = vld [vmem:[#allocation16 + $0x30] sm:$0xff]  ;;  %v346_v56 = vld [vmem:[#allocation14 + $0x20] sm:$0xff] }
  0x6f   :  { %335 = vmatpush.msra.mxu2 %v302_v21 }
  0x70   :  { %414 = vmatpush.msrb.mxu0 %v389_v37  ;;  %452 = vmatpush.msrb.mxu1 %v433_v57  ;;  %v470_v37 = vld [vmem:[#allocation16 + $0x20] sm:$0xff]  ;;  %v345_v57 = vld [vmem:[#allocation14 + $0x18] sm:$0xff] }
  0x71   :  { %336 = vmatpush.msra.mxu2 %v301_v24  ;;  %v639_v24 = vld [vmem:[%s1224_s13] ss:$0 sm:$0xff] }
  0x72   :  { %415 = vmatpush.msrb.mxu0 %v388_v39  ;;  %453 = vmatpush.msrb.mxu1 %v432_v58  ;;  %v468_v39 = vld [vmem:[#allocation16 + $0x10] sm:$0xff] }
  0x73   :  { %486 = vmatpush.msrb.mxu2 %v481_v25  ;;  %v344_v58 = vld [vmem:[#allocation14 + $0x10] sm:$0xff] }
  0x74   :  { %416 = vmatpush.msrb.mxu0 %v387_v41  ;;  %454 = vmatpush.msrb.mxu1 %v431_v59  ;;  %v467_v41 = vld [vmem:[#allocation16 + $0x8] sm:$0xff]  ;;  %v636_v59 = vld [vmem:[%s1220_s9] ss:$0 sm:$0xff] }
  0x75   :  { %487 = vmatpush.msrb.mxu2 %v480_v27  ;;  %v640_v27 = vld [vmem:[%s1228_s17] ss:$0 sm:$0xff] }
  0x76   :  { %417 = vmatpush.msrb.mxu0 %v386_v43  ;;  %455 = vmatpush.msrb.mxu1 %v430_v60  ;;  %v343_v60 = vld [vmem:[#allocation14 + $0x8] sm:$0xff] }
  0x77   :  { %488 = vmatpush.msrb.mxu2 %v479_v28 }
  0x78   :  { %418 = vmatpush.msrb.mxu0 %v385_v45  ;;  %456 = vmatpush.msrb.mxu1 %v429_v61  ;;  %v357_v45 = vld [vmem:[#allocation14 + $0x78] sm:$0xff]  ;;  %v342_v61 = vld [vmem:[#allocation14] sm:$0xff] }
  0x79   :  { %489 = vmatpush.msrb.mxu2 %v478_v29  ;;  %362 = vmatpush.msra.mxu3 %v357_v45 }
  0x7a   :  { %419 = vmatpush.msrb.mxu0 %v384_v47  ;;  %457 = vmatpush.msrb.mxu1 %v428_v62  ;;  %v355_v47 = vld [vmem:[#allocation14 + $0x68] sm:$0xff] }
  0x7b   :  { %420 = vmatmul.f32.vlgmr.msrb.gmra.mxu0 %v383_v49  ;;  %490 = vmatpush.msrb.mxu2 %v477_v30  ;;  %v353_v49 = vld [vmem:[#allocation14 + $0x58] sm:$0xff] }
  0x7c   :  { %458 = vmatpush.msrb.mxu1 %v427_v0  ;;  %363 = vmatpush.msra.mxu3 %v356_v46 }
  0x7d   :  { %491 = vmatpush.msrb.mxu2 %v476_v31 }
  0x7e   :  { %459 = vmatpush.msrb.mxu1 %v426_v1  ;;  %364 = vmatpush.msra.mxu3 %v355_v47  ;;  %v521_v1 = vld [vmem:[#allocation17 + $0x70] sm:$0xff] }
  0x7f   :  { %492 = vmatpush.msrb.mxu2 %v475_v32 }
  0x80   :  { %460 = vmatpush.msrb.mxu1 %v425_v4  ;;  %365 = vmatpush.msra.mxu3 %v354_v48  ;;  %v518_v4 = vld [vmem:[#allocation17 + $0x58] sm:$0xff] }
  0x81   :  { %493 = vmatpush.msrb.mxu2 %v474_v33 }
  0x82   :  { %366 = vmatpush.msra.mxu3 %v353_v49 }
  0x83   :  { %494 = vmatpush.msrb.mxu2 %v473_v34 }
  0x84   :  { %367 = vmatpush.msra.mxu3 %v352_v50 }
  0x85   :  { %495 = vmatpush.msrb.mxu2 %v472_v35 }
  0x86   :  { %368 = vmatpush.msra.mxu3 %v351_v51 }
  0x87   :  { %496 = vmatpush.msrb.mxu2 %v471_v36 }
  0x88   :  { %369 = vmatpush.msra.mxu3 %v350_v52 }
  0x89   :  { %497 = vmatpush.msrb.mxu2 %v470_v37 }
  0x8a   :  { %370 = vmatpush.msra.mxu3 %v349_v53 }
  0x8b   :  { %498 = vmatpush.msrb.mxu2 %v469_v38 }
  0x8c   :  { %371 = vmatpush.msra.mxu3 %v348_v54 }
  0x8d   :  { %499 = vmatpush.msrb.mxu2 %v468_v39 }
  0x8e   :  { %372 = vmatpush.msra.mxu3 %v347_v55 }
  0x8f   :  { %500 = vmatpush.msrb.mxu2 %v467_v41 }
  0x90   :  { %373 = vmatpush.msra.mxu3 %v346_v56 }
  0x91   :  { %501 = vmatpush.msrb.mxu2 %v466_v42 }
  0x92   :  { %374 = vmatpush.msra.mxu3 %v345_v57 }
  0x94   :  { %375 = vmatpush.msra.mxu3 %v344_v58 }
  0x96   :  { %376 = vmatpush.msra.mxu3 %v343_v60 }
  0x98   :  { %377 = vmatpush.msra.mxu3 %v342_v61 }
  0xd8   :  { %v256_v2 = vpop.f32.mrf.mxu0 }
  0xd9   :  { %v257_v3 = vadd.f32 %v633_v63, %v256_v2  ;;  %v522_v63 = vld [vmem:[#allocation17 + $0x78] sm:$0xff]  ;;  %v520_v2 = vld [vmem:[#allocation17 + $0x68] sm:$0xff] }
  0xda   :  { %527 = vmatpush.msrb.mxu3 %v522_v63 }
  0xdb   :  { %v259_v5 = vmax.f32 %v257_v3, 0.0  ;;  %v519_v3 = vld [vmem:[#allocation17 + $0x60] sm:$0xff] }
  0xdc   :  { %528 = vmatpush.msrb.mxu3 %v521_v1 }
  0xdd   :  { %296 = vmatmul.f32.vlgmr.msra.gmra.mxu1 %v259_v5  ;;  %v517_v5 = vld [vmem:[#allocation17 + $0x50] sm:$0xff] }
  0xde   :  { %529 = vmatpush.msrb.mxu3 %v520_v2 }
  0xe0   :  { %530 = vmatpush.msrb.mxu3 %v519_v3 }
  0xe2   :  { %531 = vmatpush.msrb.mxu3 %v518_v4 }
  0xe4   :  { %532 = vmatpush.msrb.mxu3 %v517_v5 }
  0xe6   :  { %533 = vmatpush.msrb.mxu3 %v516_v6 }
  0xe8   :  { %534 = vmatpush.msrb.mxu3 %v515_v7 }
  0xea   :  { %535 = vmatpush.msrb.mxu3 %v514_v8 }
  0xec   :  { %536 = vmatpush.msrb.mxu3 %v513_v9 }
  0xee   :  { %537 = vmatpush.msrb.mxu3 %v512_v10 }
  0xf0   :  { %538 = vmatpush.msrb.mxu3 %v511_v11 }
  0xf2   :  { %539 = vmatpush.msrb.mxu3 %v510_v12 }
  0xf4   :  { %540 = vmatpush.msrb.mxu3 %v509_v14 }
  0xf6   :  { %541 = vmatpush.msrb.mxu3 %v508_v15 }
  0xf8   :  { %v421_v22 = vpop.f32.mrf.mxu0  ;;  %542 = vmatpush.msrb.mxu3 %v507_v18 }
  0xf9   :  { %v422_v23 = vadd.f32 %v634_v19, %v421_v22 }
  0xfb   :  { %v424_v26 = vmax.f32 %v422_v23, 0.0 }
  0xfd   :  { %461 = vmatmul.f32.vlgmr.msrb.gmra.mxu1 %v424_v26 }
 0x15a   :  { %v297_v43 = vpop.f32.mrf.mxu1 }
 0x15b   :  { %v298_v44 = vadd.f32 %v635_v40, %v297_v43 }
 0x15d   :  { %300 = vst [vmem:[#allocation19] sm:$0xff] %v298_v44  ;;  %337 = vmatmul.f32.vlgmr.msra.gmra.mxu2 %v298_v44 }
 0x15e   :  { %558 = dma.vmem_to_hbm [thread:$0]  %s554_s14, 128, %s556_s8, [#allocation4]  }
 0x17a   :  { %v462_v62 = vpop.f32.mrf.mxu1 }
 0x17b   :  { %v463_v0 = vadd.f32 %v636_v59, %v462_v62 }
 0x17d   :  { %465 = vst [vmem:[#allocation20] sm:$0xff] %v463_v0  ;;  %502 = vmatmul.f32.vlgmr.msrb.gmra.mxu2 %v463_v0 }
 0x17e   :  { %569 = dma.vmem_to_hbm [thread:$0]  %s565_s11, 128, %s567_s26, [#allocation21]  }
 0x1e0   :  { %v338_v16 = vpop.f32.mrf.mxu2 }
 0x1e1   :  { %v339_v17 = vadd.f32 %v637_v13, %v338_v16 }
 0x1e3   :  { %v341_v19 = vmax.f32 %v339_v17, 0.0 }
 0x1e5   :  { %378 = vmatmul.f32.vlgmr.msra.gmra.mxu3 %v341_v19 }
 0x200   :  { %v503_v21 = vpop.f32.mrf.mxu2 }
 0x201   :  { %v504_v22 = vadd.f32 %v638_v20, %v503_v21 }
 0x203   :  { %v506_v23 = vmax.f32 %v504_v22, 0.0 }
 0x205   :  { %543 = vmatmul.f32.vlgmr.msrb.gmra.mxu3 %v506_v23 }
 0x268   :  { %v379_v25 = vpop.f32.mrf.mxu3 }
 0x269   :  { %v380_v26 = vadd.f32 %v639_v24, %v379_v25 }
 0x26b   :  { %382 = vst [vmem:[#allocation22] sm:$0xff] %v380_v26 }
 0x26c   :  { %580 = dma.vmem_to_hbm [thread:$0]  %s576_s25, 128, %s578_s3, [#allocation21]  }
 0x288   :  { %v544_v28 = vpop.f32.mrf.mxu3 }
 0x289   :  { %v545_v29 = vadd.f32 %v640_v27, %v544_v28 }
 0x28b   :  { %547 = vst [vmem:[#allocation23] sm:$0xff] %v545_v29 }
 0x28c   :  { %591 = dma.vmem_to_hbm [thread:$0]  %s587_s23, 128, %s589_s30, [#allocation24]  }
 0x28d   :  { %989 = dma.done.wait [#allocation4], 128  }
 0x28e   :  { %990 = vsyncadd [#allocation4], 4294967168 }
 0x28f   :  { %991 = dma.done.wait [#allocation21], 256  }
 0x290   :  { %992 = vsyncadd [#allocation21], 4294967040 }
 0x291   :  { %993 = dma.done.wait [#allocation24], 128  }
 0x292   :  { %994 = vsyncadd [#allocation24], 4294967168 }
 0x293   :  { %608 = vsyncpa [#allocation3], 1 }
 0x294   :  { %609 = vsyncpa [#allocation6], 1 }
 0x295   :  { %610 = vsyncpa [#allocation9], 1 }
 0x296   :  { %611 = vsyncpa [#allocation12], 1 }
 0x297   :  { %612 = vsyncpa [#allocation15], 1 }
 0x298   :  { %613 = vsyncpa [#allocation18], 1 }
 0x299   :  { %614 = vsyncpa [#allocation4], 1 }
 0x29a   :  { %615 = vsyncpa [#allocation21], 1 }
 0x29b   :  { %616 = vsyncpa [#allocation24], 1 }

</bundles_post_ra>
